<compile_context>
chip_gen: v6e
topology: v6e:2x2x1
jax: 0.10.0
libtpu: 0.0.40
codegen_flags: <defaults>
</compile_context>

<pallas_src>
import jax
import jax.numpy as jnp
from jax.experimental import pallas as pl
from jax.experimental.pallas import tpu as pltpu


def _critic_kernel(xs_ref, xa_ref, w1s_ref, w1a_ref, b1_ref, w2_ref, b2_ref, o_ref):
    # xs_ref : (TB, E)  state-embedding tile
    # xa_ref : (TB, A)  action tile
    # w1s_ref: (E, H)   top rows of w1 (state part)
    # w1a_ref: (A, H)   bottom rows of w1 (action part)
    # b1_ref : (1, H)
    # w2_ref : (1, H)   second-layer weights as a lane-dense row
    # b2_ref : (1, 1)   scalar bias in SMEM
    # o_ref  : (TB, 1)
    h = (
        jnp.dot(xs_ref[...], w1s_ref[...], preferred_element_type=jnp.float32)
        + jnp.dot(xa_ref[...], w1a_ref[...], preferred_element_type=jnp.float32)
        + b1_ref[...]
    )
    h = jnp.maximum(h, 0.0)  # ReLU on the VPU
    # Layer 2: N=1 matmul replaced with VPU multiply + XLU lane reduce (MXU stays free).
    q = jnp.sum(h * w2_ref[...], axis=-1, keepdims=True) + b2_ref[0, 0]
    o_ref[...] = q.astype(o_ref.dtype)


def critic_forward(state_embedding, action, params, *, tile_b=8192):
    """Pallas equivalent of Critic.forward.

    state_embedding: (B, E) f32
    action:          (B, A) f32
    params: dict with w1 (E+A, H), b1 (1, H), w2 (H, 1), b2 (1, 1)
    returns (B, 1) f32
    """
    B, E = state_embedding.shape
    A = action.shape[1]
    w1, b1, w2, b2 = params["w1"], params["b1"], params["w2"], params["b2"]
    H = w1.shape[1]

    # Split w1 once on the host so no (B, E+A) concat is ever materialized.
    w1_s = w1[:E, :]
    w1_a = w1[E:, :]
    w2_row = w2.reshape(1, H)  # lane-dense row for the in-kernel multiply + reduce

    # Batch tiling: one full-extent tile for small B, otherwise fixed, pipelined tiles
    # with zero-padding of a ragged last tile (padded rows are sliced off at the end).
    if B <= tile_b:
        TB = B
        B_pad = B
    else:
        TB = tile_b
        B_pad = pl.cdiv(B, TB) * TB
    if B_pad != B:
        pad = B_pad - B
        state_embedding = jnp.pad(state_embedding, ((0, pad), (0, 0)))
        action = jnp.pad(action, ((0, pad), (0, 0)))

    grid = (B_pad // TB,)

    cost = pl.CostEstimate(
        flops=2 * B_pad * (E + A) * H + 3 * B_pad * H,
        transcendentals=0,
        bytes_accessed=4 * (B_pad * (E + A) + B_pad + (E + A) * H + 2 * H + 1),
    )

    out = pl.pallas_call(
        _critic_kernel,
        out_shape=jax.ShapeDtypeStruct((B_pad, 1), jnp.float32),
        grid=grid,
        in_specs=[
            pl.BlockSpec((TB, E), lambda i: (i, 0)),            # state tile
            pl.BlockSpec((TB, A), lambda i: (i, 0)),            # action tile
            pl.BlockSpec((E, H), lambda i: (0, 0)),             # w1 (state rows), resident
            pl.BlockSpec((A, H), lambda i: (0, 0)),             # w1 (action rows), resident
            pl.BlockSpec((1, H), lambda i: (0, 0)),             # b1
            pl.BlockSpec((1, H), lambda i: (0, 0)),             # w2 as a row
            pl.BlockSpec(memory_space=pltpu.MemorySpace.SMEM),  # b2 scalar
        ],
        out_specs=pl.BlockSpec((TB, 1), lambda i: (i, 0)),
        compiler_params=pltpu.CompilerParams(
            dimension_semantics=("parallel",),  # megacore sharding where available
        ),
        cost_estimate=cost,
    )(state_embedding, action, w1_s, w1_a, b1, w2_row, b2)

    return out[:B]


def init_critic_params(key, embedding_dim, action_dim, hidden=128):
    """Deterministic synthetic init matching nn.Linear default (uniform +/- 1/sqrt(fan_in))."""
    in_dim = embedding_dim + action_dim
    k1, k2, k3, k4 = jax.random.split(key, 4)
    bound1 = 1.0 / jnp.sqrt(in_dim)
    bound2 = 1.0 / jnp.sqrt(hidden)
    return {
        "w1": jax.random.uniform(k1, (in_dim, hidden), jnp.float32, -bound1, bound1),
        "b1": jax.random.uniform(k2, (1, hidden), jnp.float32, -bound1, bound1),
        "w2": jax.random.uniform(k3, (hidden, 1), jnp.float32, -bound2, bound2),
        "b2": jax.random.uniform(k4, (1, 1), jnp.float32, -bound2, bound2),
    }


def _reference(state_embedding, action, params):
    x = jnp.concatenate([state_embedding, action], axis=1)
    h = jnp.maximum(x @ params["w1"] + params["b1"], 0.0)
    return h @ params["w2"] + params["b2"]


if __name__ == "__main__":
    embedding_dim = 32
    action_dim = 8

    key = jax.random.PRNGKey(0)
    kp, ks, ka = jax.random.split(key, 3)
    params = init_critic_params(kp, embedding_dim, action_dim)

    # 1) Small batch: single full-extent tile.
    batch = 4
    state_embedding = jax.random.normal(ks, (batch, embedding_dim), jnp.float32)
    action = jax.random.normal(ka, (batch, action_dim), jnp.float32)
    q = jax.block_until_ready(critic_forward(state_embedding, action, params))
    ref = _reference(state_embedding, action, params)
    assert q.shape == (batch, 1)
    assert jnp.allclose(q, ref, atol=1e-4, rtol=1e-4)

    # 2) Multi-tile pipelined path (including a ragged last tile) with a small forced tile.
    for batch2 in (32, 20):
        se2 = jax.random.normal(
            jax.random.fold_in(ks, batch2), (batch2, embedding_dim), jnp.float32
        )
        ac2 = jax.random.normal(
            jax.random.fold_in(ka, batch2), (batch2, action_dim), jnp.float32
        )
        q2 = jax.block_until_ready(critic_forward(se2, ac2, params, tile_b=8))
        ref2 = _reference(se2, ac2, params)
        assert q2.shape == (batch2, 1)
        assert jnp.allclose(q2, ref2, atol=1e-4, rtol=1e-4)

    print("KERNEL_OK")
</pallas_src>

<mosaic_0001>
module attributes {stable_mosaic.version = 11 : i64} {
  func.func @_critic_kernel(%arg0: i32, %arg1: memref<4x32xf32, #tpu.memory_space<vmem>>, %arg2: memref<4x8xf32, #tpu.memory_space<vmem>>, %arg3: memref<32x128xf32, #tpu.memory_space<vmem>>, %arg4: memref<8x128xf32, #tpu.memory_space<vmem>>, %arg5: memref<1x128xf32, #tpu.memory_space<vmem>>, %arg6: memref<1x128xf32, #tpu.memory_space<vmem>>, %arg7: memref<1x1xf32, #tpu.memory_space<smem>>, %arg8: memref<4x1xf32, #tpu.memory_space<vmem>>) attributes {dimension_semantics = [#tpu.dimension_semantics<parallel>], iteration_bounds = array<i64: 1>, scalar_prefetch = 0 : i64, scratch_operands = 0 : i64, tpu.core_type = #tpu.core_type<tc>, window_params = [{transform_indices = @transform_0, window_bounds = array<i64: 4, 32>}, {transform_indices = @transform_1, window_bounds = array<i64: 4, 8>}, {pipeline_mode = #tpu.pipeline_mode<synchronous>, transform_indices = @transform_2, window_bounds = array<i64: 32, 128>}, {pipeline_mode = #tpu.pipeline_mode<synchronous>, transform_indices = @transform_3, window_bounds = array<i64: 8, 128>}, {pipeline_mode = #tpu.pipeline_mode<synchronous>, transform_indices = @transform_4, window_bounds = array<i64: 1, 128>}, {pipeline_mode = #tpu.pipeline_mode<synchronous>, transform_indices = @transform_5, window_bounds = array<i64: 1, 128>}, {transform_indices = @transform_6, window_bounds = array<i64: 1, 1>}, {transform_indices = @transform_7, window_bounds = array<i64: 4, 1>}]} {
    %c0 = arith.constant 0 : index
    %c0_0 = arith.constant 0 : index
    %0 = vector.load %arg1[%c0, %c0_0] : memref<4x32xf32, #tpu.memory_space<vmem>>, vector<4x32xf32>
    %c0_1 = arith.constant 0 : index
    %c0_2 = arith.constant 0 : index
    %1 = vector.load %arg3[%c0_1, %c0_2] : memref<32x128xf32, #tpu.memory_space<vmem>>, vector<32x128xf32>
    %cst = arith.constant dense<0.000000e+00> : vector<4x128xf32>
    %2 = tpu.matmul %0, %1, %cst {dimension_numbers = #tpu.dot_dimension_numbers<[1], [0], [0], [1], [0, 0, 1, 1], [], []>} : vector<4x32xf32>, vector<32x128xf32>, vector<4x128xf32> -> vector<4x128xf32>
    %c0_3 = arith.constant 0 : index
    %c0_4 = arith.constant 0 : index
    %3 = vector.load %arg2[%c0_3, %c0_4] : memref<4x8xf32, #tpu.memory_space<vmem>>, vector<4x8xf32>
    %c0_5 = arith.constant 0 : index
    %c0_6 = arith.constant 0 : index
    %4 = vector.load %arg4[%c0_5, %c0_6] : memref<8x128xf32, #tpu.memory_space<vmem>>, vector<8x128xf32>
    %cst_7 = arith.constant dense<0.000000e+00> : vector<4x128xf32>
    %5 = tpu.matmul %3, %4, %cst_7 {dimension_numbers = #tpu.dot_dimension_numbers<[1], [0], [0], [1], [0, 0, 1, 1], [], []>} : vector<4x8xf32>, vector<8x128xf32>, vector<4x128xf32> -> vector<4x128xf32>
    %6 = arith.addf %2, %5 : vector<4x128xf32>
    %c0_8 = arith.constant 0 : index
    %c0_9 = arith.constant 0 : index
    %7 = vector.load %arg5[%c0_8, %c0_9] : memref<1x128xf32, #tpu.memory_space<vmem>>, vector<1x128xf32>
    %8 = vector.broadcast %7 : vector<1x128xf32> to vector<4x128xf32>
    %9 = arith.addf %6, %8 : vector<4x128xf32>
    %cst_10 = arith.constant 0.000000e+00 : f32
    %10 = vector.broadcast %cst_10 : f32 to vector<4x128xf32>
    %11 = arith.maximumf %9, %10 : vector<4x128xf32>
    %c0_11 = arith.constant 0 : index
    %c0_12 = arith.constant 0 : index
    %12 = vector.load %arg6[%c0_11, %c0_12] : memref<1x128xf32, #tpu.memory_space<vmem>>, vector<1x128xf32>
    %13 = vector.broadcast %12 : vector<1x128xf32> to vector<4x128xf32>
    %14 = arith.mulf %11, %13 : vector<4x128xf32>
    %cst_13 = arith.constant dense<0.000000e+00> : vector<4xf32>
    %15 = vector.multi_reduction <add>, %14, %cst_13 [1] : vector<4x128xf32> to vector<4xf32>
    %16 = vector.shape_cast %15 : vector<4xf32> to vector<4x1xf32>
    %c0_14 = arith.constant 0 : index
    %c0_15 = arith.constant 0 : index
    %17 = memref.load %arg7[%c0_14, %c0_15] : memref<1x1xf32, #tpu.memory_space<smem>>
    %18 = vector.broadcast %17 : f32 to vector<4x1xf32>
    %19 = arith.addf %16, %18 : vector<4x1xf32>
    %c0_16 = arith.constant 0 : index
    %c0_17 = arith.constant 0 : index
    %20 = vector.load %arg8[%c0_16, %c0_17] : memref<4x1xf32, #tpu.memory_space<vmem>>, vector<4x1xf32>
    tpu.vector_store %arg8[%c0_16, %c0_17], %19 {strides = array<i32>} : memref<4x1xf32, #tpu.memory_space<vmem>>, vector<4x1xf32>,
    return
  }
  func.func @transform_0(%arg0: i32) -> (i32, i32) {
    %c0_i32 = arith.constant 0 : i32
    %c0_i32_0 = arith.constant 0 : i32
    return %arg0, %c0_i32 : i32, i32
  }
  func.func @transform_1(%arg0: i32) -> (i32, i32) {
    %c0_i32 = arith.constant 0 : i32
    %c0_i32_0 = arith.constant 0 : i32
    return %arg0, %c0_i32 : i32, i32
  }
  func.func @transform_2(%arg0: i32) -> (i32, i32) {
    %c0_i32 = arith.constant 0 : i32
    %c0_i32_0 = arith.constant 0 : i32
    %c0_i32_1 = arith.constant 0 : i32
    return %c0_i32, %c0_i32_0 : i32, i32
  }
  func.func @transform_3(%arg0: i32) -> (i32, i32) {
    %c0_i32 = arith.constant 0 : i32
    %c0_i32_0 = arith.constant 0 : i32
    %c0_i32_1 = arith.constant 0 : i32
    return %c0_i32, %c0_i32_0 : i32, i32
  }
  func.func @transform_4(%arg0: i32) -> (i32, i32) {
    %c0_i32 = arith.constant 0 : i32
    %c0_i32_0 = arith.constant 0 : i32
    %c0_i32_1 = arith.constant 0 : i32
    return %c0_i32, %c0_i32_0 : i32, i32
  }
  func.func @transform_5(%arg0: i32) -> (i32, i32) {
    %c0_i32 = arith.constant 0 : i32
    %c0_i32_0 = arith.constant 0 : i32
    %c0_i32_1 = arith.constant 0 : i32
    return %c0_i32, %c0_i32_0 : i32, i32
  }
  func.func @transform_6(%arg0: i32) -> (i32, i32) {
    %c0_i32 = arith.constant 0 : i32
    %c0_i32_0 = arith.constant 0 : i32
    %c0_i32_1 = arith.constant 0 : i32
    return %c0_i32, %c0_i32_0 : i32, i32
  }
  func.func @transform_7(%arg0: i32) -> (i32, i32) {
    %c0_i32 = arith.constant 0 : i32
    %c0_i32_0 = arith.constant 0 : i32
    return %arg0, %c0_i32 : i32, i32
  }
}

</mosaic_0001>

<bundles_post_ra>
// kernel: tpu_custom_call.1
= control target key start
LH: loop header
LB: loop body
LE: loop exit
PB: predicated region body
PF: predicated region fallthrough
CT: control target
= control target key end

     0   :  { %13 = vsyncpa [#allocation4], 0  ;;  %s457_s0 = inlined_call_operand.hbm [shape: f32[4,32], index: 0, kind: input, shape index: {}]   ;;  %s458_s1 = inlined_call_operand.hbm [shape: f32[4,8], index: 1, kind: input, shape index: {}]   ;;  %s459_s2 = inlined_call_operand.hbm [shape: f32[32,128], index: 2, kind: input, shape index: {}]   ;;  %s460_s3 = inlined_call_operand.hbm [shape: f32[8,128], index: 3, kind: input, shape index: {}]   ;;  %s461_s4 = inlined_call_operand.vmem [shape: f32[1,128], index: 4, kind: input, shape index: {}]   ;;  %s462_s5 = inlined_call_operand.vmem [shape: f32[1,128], index: 5, kind: input, shape index: {}]   ;;  %s463_s6 = inlined_call_operand.<no memory space> [shape: f32[1,1], index: 6, kind: input, shape index: {}]   ;;  %s464_s7 = inlined_call_operand.vmem [shape: f32[4,1], index: 7, kind: output, shape index: {}]  }
   0x1   :  { %14 = vsyncpa [#allocation6], 0 }
   0x2   :  { %15 = vsyncpa [#allocation9], 0  ;;  %s385_s24 = smov [#allocation5]   ;;  %s386_s26 = smov [#allocation3]  }
   0x3   :  { %s32_s25 = sshll.u32 %s385_s24, 4  ;;  %s22_s27 = sshll.u32 %s386_s26, 4  ;;  %s33_s25 = int_to_ptr.vmem [resolvable:$true] %s32_s25  ;;  %s23_s27 = int_to_ptr.vmem [resolvable:$true] %s22_s27 }
   0x4   :  { %s307_s28 = scalar_lea.vmem %s33_s25, 64  ;;  %p312_p1 = scmp.lt.s32.totalorder %s33_s25, %s33_s25 }
   0x5   :  { %p308_p0 = scmp.ne.s32.totalorder %s33_s25, %s307_s28  ;;  %p313_p2 = scmp.lt.s32.totalorder %s307_s28, %s307_s28 }
   0x7   :  { %p314_p3 = por %p313_p2, %p312_p1 }
   0x9   :  { %p315_p4 = pnand %p314_p3, %p308_p0 }
   0xb   :  { %318 = shalt.err (!%p315_p4)
}
   0xc   :  { %35 = dma.hbm_to_vmem [thread:$0]  %s458_s1, 64, %s33_s25, [#allocation6]  }
   0xd   :  { %s327_s8 = scalar_lea.vmem %s23_s27, 64  ;;  %p332_p6 = scmp.lt.s32.totalorder %s23_s27, %s23_s27 }
   0xe   :  { %p328_p5 = scmp.ne.s32.totalorder %s23_s27, %s327_s8  ;;  %p333_p7 = scmp.lt.s32.totalorder %s327_s8, %s327_s8 }
  0x10   :  { %p334_p8 = por %p333_p7, %p332_p6 }
  0x12   :  { %p335_p9 = pnand %p334_p8, %p328_p5 }
  0x14   :  { %338 = shalt.err (!%p335_p9)
}
  0x15   :  { %25 = dma.hbm_to_vmem [thread:$0]  %s457_s0, 64, %s23_s27, [#allocation4]  }
  0x16   :  { %s387_s11 = smov [#allocation7]  }
  0x17   :  { %s41_s12 = sshll.u32 %s387_s11, 4  ;;  %s42_s12 = int_to_ptr.vmem [resolvable:$true] %s41_s12 }
  0x18   :  { %s347_s13 = scalar_lea.vmem %s42_s12, 512  ;;  %p352_p11 = scmp.lt.s32.totalorder %s42_s12, %s42_s12 }
  0x19   :  { %p348_p10 = scmp.ne.s32.totalorder %s42_s12, %s347_s13  ;;  %p353_p12 = scmp.lt.s32.totalorder %s347_s13, %s347_s13 }
  0x1b   :  { %p354_p13 = por %p353_p12, %p352_p11 }
  0x1d   :  { %p355_p0 = pnand %p354_p13, %p348_p10 }
  0x1f   :  { %358 = shalt.err (!%p355_p0)
}
  0x20   :  { %s388_s1 = smov 128   ;;  %s389_s14 = smov 8  }
  0x21   :  { %47 = dma.hbm_to_vmem [thread:$0]  %s459_s2, 512, %s42_s12, [#allocation6], %s388_s1, %s388_s1, %s389_s14  }
  0x22   :  { %s390_s17 = smov [#allocation8]  }
  0x23   :  { %s54_s18 = sshll.u32 %s390_s17, 4  ;;  %s55_s18 = int_to_ptr.vmem [resolvable:$true] %s54_s18 }
  0x24   :  { %s367_s0 = scalar_lea.vmem %s55_s18, 128  ;;  %p372_p2 = scmp.lt.s32.totalorder %s55_s18, %s55_s18 }
  0x25   :  { %p368_p1 = scmp.ne.s32.totalorder %s55_s18, %s367_s0  ;;  %p373_p3 = scmp.lt.s32.totalorder %s367_s0, %s367_s0 }
  0x27   :  { %p374_p4 = por %p373_p3, %p372_p2 }
  0x29   :  { %p375_p5 = pnand %p374_p4, %p368_p1 }
  0x2b   :  { %378 = shalt.err (!%p375_p5)
}
  0x2c   :  { %57 = dma.hbm_to_vmem [thread:$0]  %s460_s3, 128, %s55_s18, [#allocation9]  }
  0x2d   :  { %379 = dma.done.wait [#allocation4], 64  }
  0x2e   :  { %380 = vsyncadd [#allocation4], 4294967232 }
  0x2f   :  { %381 = dma.done.wait [#allocation6], 576  }
  0x30   :  { %382 = vsyncadd [#allocation6], 4294966720 }
  0x31   :  { %383 = dma.done.wait [#allocation9], 128  }
  0x32   :  { %384 = vsyncadd [#allocation9], 4294967168  ;;  %v391_v0 = vmov 0.0   ;;  %vm392_vm0 = vmmov 0   ;;  %vm83_vm1 = vcmask 64512   ;;  %v80_v1 = vld [vmem:[#allocation7 + $0x18] sm:$0xff]  ;;  %v253_v19 = vstv %s463_s6 }
  0x33   :  { %280 = vmatprep.subr.mxu1 %v391_v0  ;;  %275 = vmatprep.subr.mxu0 %v391_v0  ;;  %v79_v2 = vld [vmem:[#allocation7 + $0x10] sm:$0xff]  ;;  %v82_v3 = vld [vmem:[#allocation8] sm:$0xff]  ;;  %v81_v4 = vld [vmem:[#allocation5] sm:$0xf]  ;;  %vm157_vm2 = vcmask 261120   ;;  %vm248_vm3 = vcmask 1043456  }
  0x34   :  { %277 = vmatprep.mubr.msk.f32.mxu0 %vm392_vm0, %v391_v0  ;;  %288 = vmatprep.mubr.msk.f32.mxu1 %vm392_vm0, %v391_v0  ;;  %v78_v5 = vld [vmem:[#allocation7 + $0x8] sm:$0xff]  ;;  %v77_v6 = vld [vmem:[#allocation7] sm:$0xff]  ;;  %v76_v7 = vld [vmem:[#allocation3] sm:$0xf]  ;;  %vm255_vm4 = vcmask 3072  }
  0x35   :  { %281 = vmatpush3.msra.mxu1 %v80_v1  ;;  %276 = vmatpush3.msra.mxu0 %v82_v3  ;;  %v266_v11 = vld [vmem:[%s461_s4] ss:$0 sm:$0xff] }
  0x36   :  { %282 = vmatprep.subr.mxu1 %v391_v0  ;;  %278 = vmatmul.mubr.msk.f32.vlgmr.msra.gmra.mxu0 %vm83_vm1, %v81_v4  ;;  %v267_v15 = vld [vmem:[%s462_s5] ss:$0 sm:$0xff] }
  0x37   :  { %283 = vmatpush3.msra.mxu1 %v79_v2 }
  0x38   :  { %284 = vmatprep.subr.mxu1 %v391_v0 }
  0x39   :  { %285 = vmatpush3.msra.mxu1 %v78_v5 }
  0x3a   :  { %286 = vmatprep.subr.mxu1 %v391_v0 }
  0x3b   :  { %287 = vmatpush3.msra.mxu1 %v77_v6 }
  0x3c   :  { %289 = vmatmul.mubr.msk.f32.vlgmr.msra.gmra.mxu1 %vm157_vm2, %v76_v7 }
  0xf6   :  { %v153_v8 = vpop.f32.mrf.mxu0 }
  0xf8   :  { %v279_v9 = vpop.f32.mrf.mxu0 }
  0xfc   :  { %v227_v10 = vpop.f32.mrf.mxu1 }
  0xfd   :  { %v228_v12 = vadd.f32 %v227_v10, %v153_v8 }
  0xfe   :  { %v290_v13 = vpop.f32.mrf.mxu1 }
  0xff   :  { %v238_v14 = vadd.f32 %v266_v11, %v228_v12 }
 0x101   :  { %v239_v16 = vmax.f32 %v238_v14, 0.0 }
 0x103   :  { %v247_v17 = vmul.f32 %v267_v15, %v239_v16 }
 0x105   :  { %v249_v18 = vsel %vm248_vm3, %v247_v17, 0.0 }
 0x106   :  { %250 = vadd.xlane.f32.xlu0 %v249_v18 }
 0x18f   :  { %v251_v20 = vpop.xlane.xlu0 %250 }
 0x190   :  { %v254_v21 = vadd.f32 %v253_v19, %v251_v20 }
 0x192   :  { %256 = vst.msk [vmem:[%s464_s7] sm:$0xf] %vm255_vm4, %v254_v21 }
 0x193   :  { %261 = vsyncpa [#allocation4], 1 }
 0x194   :  { %262 = vsyncpa [#allocation6], 1 }
 0x195   :  { %263 = vsyncpa [#allocation9], 1 }

</bundles_post_ra>
